<compile_context>
chip_gen: v5e
topology: v5e:2x2
jax: 0.10.0
libtpu: 0.0.40
codegen_flags: <defaults>
</compile_context>

<pallas_src>
import jax
import jax.numpy as jnp
from jax import lax
from jax.experimental import pallas as pl
from jax.experimental.pallas import tpu as pltpu

BN_EPS = 1e-5
LANE = 128


def _round_up(n, m):
    return ((n + m - 1) // m) * m


def _layer(x_f32, w, gamma, beta, inv_b):
    """One Linear(no-bias) -> BatchNorm1d(train) -> ReLU block.

    Matmul runs in the weight dtype (bf16 recommended) with f32 accumulation
    on the MXU; all BN / activation math stays f32.  Returns the ReLU output
    (caller decides whether to add the residual).
    """
    h = jnp.dot(x_f32.astype(w.dtype), w, preferred_element_type=jnp.float32)
    # Single reduction pass: sum and sum-of-squares.
    s = jnp.sum(h, axis=0, keepdims=True)
    s2 = jnp.sum(h * h, axis=0, keepdims=True)
    mean = s * inv_b
    var = jnp.maximum(s2 * inv_b - mean * mean, 0.0)
    # Fused affine: scale = gamma * rsqrt(var+eps), shift = beta - mean*scale.
    scale = gamma * lax.rsqrt(var + BN_EPS)
    shift = beta - mean * scale
    return jnp.maximum(h * scale + shift, 0.0)


def _make_resident_kernel(num_layers: int, batch: int):
    """All layer weights resident in VMEM; grid = (G,)."""
    inv_b = 1.0 / float(batch)

    def kernel(x_ref, w_ref, gamma_ref, beta_ref, o_ref):
        # x_ref: (1, B, Dp)  w_ref: (L, Dp, Dp)  gamma/beta: (L, 1, Dp)
        x = x_ref[0].astype(jnp.float32)
        for l in range(num_layers):
            r = _layer(x, w_ref[l], gamma_ref[l], beta_ref[l], inv_b)
            x = x + r if l < num_layers - 1 else r
        o_ref[0] = x.astype(o_ref.dtype)

    return kernel


def _make_streamed_kernel(num_layers: int, batch: int):
    """Per-layer weight streaming; grid = (G, L), L innermost ("arbitrary")."""
    inv_b = 1.0 / float(batch)

    def kernel(x_ref, w_ref, gamma_ref, beta_ref, o_ref, xs_ref):
        # x_ref: (1, B, Dp)  w_ref: (1, Dp, Dp)  gamma/beta: (1, 1, Dp)
        # xs_ref: (B, Dp) f32 scratch carrying the activation across layers.
        l = pl.program_id(1)

        @pl.when(l == 0)
        def _():
            xs_ref[...] = x_ref[0].astype(jnp.float32)

        x = xs_ref[...]
        r = _layer(x, w_ref[0], gamma_ref[0], beta_ref[0], inv_b)

        @pl.when(l < num_layers - 1)
        def _():
            xs_ref[...] = x + r            # ResidualFC

        @pl.when(l == num_layers - 1)
        def _():
            o_ref[0] = r.astype(o_ref.dtype)   # final block: no residual

    return kernel


def prepare_generator_params(weights, gammas, betas, *, weight_dtype=jnp.bfloat16):
    """Pad / cast the Generator parameters ONCE (cache the result; do NOT redo
    this per forward call).

    weights: (L, D, D) laid out so y = x @ weights[l]  (transpose of the
             PyTorch Linear weight).  The Linear bias is intentionally not an
             input: it is a mathematical no-op under training-mode BN.
    gammas, betas: (L, D) or (L, 1, D) BatchNorm affine parameters.
    """
    num_layers, dim, dim2 = weights.shape
    assert dim == dim2, "Generator requires square hidden layers"
    gammas = gammas.reshape(num_layers, 1, dim).astype(jnp.float32)
    betas = betas.reshape(num_layers, 1, dim).astype(jnp.float32)
    weights = weights.astype(jnp.float32)

    dim_p = _round_up(dim, LANE)
    pad = dim_p - dim
    if pad:
        # Zero weight rows/cols, gamma=1, beta=0 in the padding -> padded
        # lanes stay exactly 0 through every layer, residual path included.
        weights = jnp.pad(weights, ((0, 0), (0, pad), (0, pad)))
        gammas = jnp.pad(gammas, ((0, 0), (0, 0), (0, pad)), constant_values=1.0)
        betas = jnp.pad(betas, ((0, 0), (0, 0), (0, pad)))

    return dict(
        weights=weights.astype(weight_dtype),  # bf16: ~3x MXU + half VMEM
        gammas=gammas,
        betas=betas,
        dim=dim,
        dim_p=dim_p,
        num_layers=num_layers,
    )


def _vmem_limit_bytes(num_layers, batch, dim_p, w_itemsize, streamed):
    act = batch * dim_p * 4
    if streamed:
        w_bytes = 2 * dim_p * dim_p * w_itemsize       # double-buffered layer
        affine = 2 * 2 * 2 * dim_p * 4                 # gamma+beta, 2-deep
        scratch = act                                  # carried activation
    else:
        w_bytes = 2 * num_layers * dim_p * dim_p * w_itemsize
        affine = 2 * 2 * num_layers * dim_p * 4
        scratch = 0
    total = w_bytes + affine + scratch + 4 * act       # x / out double-buffered
    return int(min(64 << 20, max(16 << 20, 2 * total)))


def generator_forward(x, params, *, stream_weights=None):
    """medgan Generator forward (training-mode BN) in one Pallas call.

    x: (B, D) noise, or (G, B, D) for G independent batches (each gets its own
       BatchNorm statistics, exactly like G separate module calls).  Prefer a
       large B (>=128 rows on v5e, >=256 on v6e/v7x) and/or G > 1 per call:
       tiny batches are launch-overhead / MXU-row-utilization bound.
    params: output of prepare_generator_params (padded/cast once, cached).
    Returns the LANE-PADDED output (..., B, dim_p); slice [..., :params['dim']]
    only if the consumer cannot accept the padded layout.
    """
    w_p, g_p, b_p = params["weights"], params["gammas"], params["betas"]
    dim, dim_p, num_layers = params["dim"], params["dim_p"], params["num_layers"]

    squeeze = (x.ndim == 2)
    if squeeze:
        x = x[None]
    groups, batch, d_in = x.shape
    assert d_in == dim, f"expected feature dim {dim}, got {d_in}"

    pad = dim_p - dim
    if pad:
        x = jnp.pad(x, ((0, 0), (0, 0), (0, pad)))

    if stream_weights is None:
        # Auto: stream per-layer weights when the (double-buffered) resident
        # stack would eat more than ~24 MiB of VMEM (v7x scoped default: 32).
        stream_weights = 2 * w_p.size * w_p.dtype.itemsize > (24 << 20)

    vmem_limit = _vmem_limit_bytes(num_layers, batch, dim_p,
                                   w_p.dtype.itemsize, stream_weights)
    out_shape = jax.ShapeDtypeStruct((groups, batch, dim_p), x.dtype)

    if stream_weights:
        out = pl.pallas_call(
            _make_streamed_kernel(num_layers, batch),
            out_shape=out_shape,
            grid=(groups, num_layers),
            in_specs=[
                pl.BlockSpec((1, batch, dim_p), lambda g, l: (g, 0, 0)),
                pl.BlockSpec((1, dim_p, dim_p), lambda g, l: (l, 0, 0)),
                pl.BlockSpec((1, 1, dim_p), lambda g, l: (l, 0, 0)),
                pl.BlockSpec((1, 1, dim_p), lambda g, l: (l, 0, 0)),
            ],
            out_specs=pl.BlockSpec((1, batch, dim_p), lambda g, l: (g, 0, 0)),
            scratch_shapes=[pltpu.VMEM((batch, dim_p), jnp.float32)],
            compiler_params=pltpu.CompilerParams(
                dimension_semantics=("parallel", "arbitrary"),
                vmem_limit_bytes=vmem_limit),
        )(x, w_p, g_p, b_p)
    else:
        out = pl.pallas_call(
            _make_resident_kernel(num_layers, batch),
            out_shape=out_shape,
            grid=(groups,),
            in_specs=[
                pl.BlockSpec((1, batch, dim_p), lambda g: (g, 0, 0)),
                pl.BlockSpec((num_layers, dim_p, dim_p), lambda g: (0, 0, 0)),
                pl.BlockSpec((num_layers, 1, dim_p), lambda g: (0, 0, 0)),
                pl.BlockSpec((num_layers, 1, dim_p), lambda g: (0, 0, 0)),
            ],
            out_specs=pl.BlockSpec((1, batch, dim_p), lambda g: (g, 0, 0)),
            compiler_params=pltpu.CompilerParams(
                dimension_semantics=("parallel",),
                vmem_limit_bytes=vmem_limit),
        )(x, w_p, g_p, b_p)

    return out[0] if squeeze else out


def reference_forward(x, weights, biases, gammas, betas):
    """Pure-JAX reference of the PyTorch module (INCLUDING the Linear bias)."""
    num_layers = weights.shape[0]
    x = x.astype(jnp.float32)
    for l in range(num_layers):
        h = x @ weights[l] + biases[l]
        mean = jnp.mean(h, axis=0, keepdims=True)
        var = jnp.mean((h - mean) ** 2, axis=0, keepdims=True)
        hn = (h - mean) * lax.rsqrt(var + BN_EPS) * gammas[l] + betas[l]
        r = jnp.maximum(hn, 0.0)
        x = x + r if l < num_layers - 1 else r
    return x


if __name__ == "__main__":
    # Small shapes consistent with the module:
    #   randomDim = 32, hiddenDim = (32, 32, 32) -> 2 ResidualFC blocks + final
    batch = 8          # rows per BN group (use >=128/256 in production)
    dim = 32
    hidden_dim = (dim, dim, dim)
    num_layers = len(hidden_dim)
    groups = 2         # two independent noise batches in one launch

    key = jax.random.PRNGKey(0)
    kx, kw, kb, kg, kbt = jax.random.split(key, 5)

    x = jax.random.normal(kx, (groups, batch, dim), dtype=jnp.float32)

    # Deterministic synthetic parameters (no checkpoint).  Linear weights are
    # stored pre-transposed: y = x @ W[l] (+ b[l], reference only).
    weights = 0.1 * jax.random.normal(kw, (num_layers, dim, dim), dtype=jnp.float32)
    biases = 0.1 * jax.random.normal(kb, (num_layers, 1, dim), dtype=jnp.float32)
    gammas = 1.0 + 0.05 * jax.random.normal(kg, (num_layers, 1, dim), dtype=jnp.float32)
    betas = 0.05 * jax.random.normal(kbt, (num_layers, 1, dim), dtype=jnp.float32)

    # PyTorch-faithful reference, one BN group at a time (keeps the bias; the
    # kernel drops it since training-mode BN cancels it exactly).
    ref = jnp.stack([reference_forward(x[g], weights, biases, gammas, betas)
                     for g in range(groups)])

    # 1) f32 weights, resident layout: tight tolerance (proves semantics).
    params_f32 = prepare_generator_params(weights, gammas, betas,
                                          weight_dtype=jnp.float32)
    out_f32 = jax.block_until_ready(generator_forward(x, params_f32))
    out_f32 = out_f32[..., :dim]              # test-only slice off lane padding
    assert out_f32.shape == (groups, batch, dim)
    assert jnp.allclose(out_f32, ref, atol=1e-4, rtol=1e-4), \
        "f32 Pallas output mismatch vs reference"

    # 2) bf16 weights (recommended perf mode): ~3x MXU, half the weight VMEM.
    params_bf16 = prepare_generator_params(weights, gammas, betas,
                                           weight_dtype=jnp.bfloat16)
    out_bf16 = jax.block_until_ready(generator_forward(x, params_bf16))
    out_bf16 = out_bf16[..., :dim]
    assert jnp.allclose(out_bf16, ref, atol=1e-1, rtol=1e-1), \
        "bf16 Pallas output drifted too far from the f32 reference"

    # 3) Streamed-weight layout (large-D / v7x VMEM variant): must match the
    #    resident bf16 result.
    out_stream = jax.block_until_ready(
        generator_forward(x, params_bf16, stream_weights=True))
    out_stream = out_stream[..., :dim]
    assert jnp.allclose(out_stream, out_bf16, atol=1e-4, rtol=1e-4), \
        "streamed-weight path mismatch vs resident path"

    print("KERNEL_OK")
</pallas_src>

<mosaic_0001>
module attributes {stable_mosaic.version = 11 : i64} {
  func.func @kernel(%arg0: i32, %arg1: memref<1x8x128xf32, #tpu.memory_space<vmem>>, %arg2: memref<3x128x128xf32, #tpu.memory_space<vmem>>, %arg3: memref<3x1x128xf32, #tpu.memory_space<vmem>>, %arg4: memref<3x1x128xf32, #tpu.memory_space<vmem>>, %arg5: memref<1x8x128xf32, #tpu.memory_space<vmem>>) attributes {dimension_semantics = [#tpu.dimension_semantics<parallel>], iteration_bounds = array<i64: 2>, scalar_prefetch = 0 : i64, scratch_operands = 0 : i64, tpu.core_type = #tpu.core_type<tc>, window_params = [{transform_indices = @transform_0, window_bounds = array<i64: 1, 8, 128>}, {pipeline_mode = #tpu.pipeline_mode<synchronous>, transform_indices = @transform_1, window_bounds = array<i64: 3, 128, 128>}, {pipeline_mode = #tpu.pipeline_mode<synchronous>, transform_indices = @transform_2, window_bounds = array<i64: 3, 1, 128>}, {pipeline_mode = #tpu.pipeline_mode<synchronous>, transform_indices = @transform_3, window_bounds = array<i64: 3, 1, 128>}, {transform_indices = @transform_4, window_bounds = array<i64: 1, 8, 128>}]} {
    %c0 = arith.constant 0 : index
    %c0_0 = arith.constant 0 : index
    %c0_1 = arith.constant 0 : index
    %0 = vector.load %arg1[%c0, %c0_0, %c0_1] : memref<1x8x128xf32, #tpu.memory_space<vmem>>, vector<1x8x128xf32>
    %1 = vector.shape_cast %0 : vector<1x8x128xf32> to vector<8x128xf32>
    %c0_2 = arith.constant 0 : index
    %c0_3 = arith.constant 0 : index
    %c0_4 = arith.constant 0 : index
    %2 = vector.load %arg2[%c0_2, %c0_3, %c0_4] : memref<3x128x128xf32, #tpu.memory_space<vmem>>, vector<1x128x128xf32>
    %3 = vector.shape_cast %2 : vector<1x128x128xf32> to vector<128x128xf32>
    %c0_5 = arith.constant 0 : index
    %c0_6 = arith.constant 0 : index
    %c0_7 = arith.constant 0 : index
    %4 = vector.load %arg3[%c0_5, %c0_6, %c0_7] : memref<3x1x128xf32, #tpu.memory_space<vmem>>, vector<1x1x128xf32>
    %5 = vector.shape_cast %4 : vector<1x1x128xf32> to vector<1x128xf32>
    %c0_8 = arith.constant 0 : index
    %c0_9 = arith.constant 0 : index
    %c0_10 = arith.constant 0 : index
    %6 = vector.load %arg4[%c0_8, %c0_9, %c0_10] : memref<3x1x128xf32, #tpu.memory_space<vmem>>, vector<1x1x128xf32>
    %7 = vector.shape_cast %6 : vector<1x1x128xf32> to vector<1x128xf32>
    %cst = arith.constant dense<0.000000e+00> : vector<8x128xf32>
    %8 = tpu.matmul %1, %3, %cst {dimension_numbers = #tpu.dot_dimension_numbers<[1], [0], [0], [1], [0, 0, 1, 1], [], []>} : vector<8x128xf32>, vector<128x128xf32>, vector<8x128xf32> -> vector<8x128xf32>
    %cst_11 = arith.constant dense<0.000000e+00> : vector<128xf32>
    %9 = vector.multi_reduction <add>, %8, %cst_11 [0] : vector<8x128xf32> to vector<128xf32>
    %10 = vector.shape_cast %9 : vector<128xf32> to vector<1x128xf32>
    %11 = arith.mulf %8, %8 : vector<8x128xf32>
    %cst_12 = arith.constant dense<0.000000e+00> : vector<128xf32>
    %12 = vector.multi_reduction <add>, %11, %cst_12 [0] : vector<8x128xf32> to vector<128xf32>
    %13 = vector.shape_cast %12 : vector<128xf32> to vector<1x128xf32>
    %cst_13 = arith.constant 1.250000e-01 : f32
    %14 = vector.broadcast %cst_13 : f32 to vector<1x128xf32>
    %15 = arith.mulf %10, %14 : vector<1x128xf32>
    %cst_14 = arith.constant 1.250000e-01 : f32
    %16 = vector.broadcast %cst_14 : f32 to vector<1x128xf32>
    %17 = arith.mulf %13, %16 : vector<1x128xf32>
    %18 = arith.mulf %15, %15 : vector<1x128xf32>
    %19 = arith.subf %17, %18 : vector<1x128xf32>
    %cst_15 = arith.constant 0.000000e+00 : f32
    %20 = vector.broadcast %cst_15 : f32 to vector<1x128xf32>
    %21 = arith.maximumf %19, %20 : vector<1x128xf32>
    %cst_16 = arith.constant 9.99999974E-6 : f32
    %22 = vector.broadcast %cst_16 : f32 to vector<1x128xf32>
    %23 = arith.addf %21, %22 : vector<1x128xf32>
    %24 = math.rsqrt %23 : vector<1x128xf32>
    %25 = arith.mulf %5, %24 : vector<1x128xf32>
    %26 = arith.mulf %15, %25 : vector<1x128xf32>
    %27 = arith.subf %7, %26 : vector<1x128xf32>
    %28 = vector.broadcast %25 : vector<1x128xf32> to vector<8x128xf32>
    %29 = arith.mulf %8, %28 : vector<8x128xf32>
    %30 = vector.broadcast %27 : vector<1x128xf32> to vector<8x128xf32>
    %31 = arith.addf %29, %30 : vector<8x128xf32>
    %cst_17 = arith.constant 0.000000e+00 : f32
    %32 = vector.broadcast %cst_17 : f32 to vector<8x128xf32>
    %33 = arith.maximumf %31, %32 : vector<8x128xf32>
    %34 = arith.addf %1, %33 : vector<8x128xf32>
    %c1 = arith.constant 1 : index
    %c0_18 = arith.constant 0 : index
    %c0_19 = arith.constant 0 : index
    %35 = vector.load %arg2[%c1, %c0_18, %c0_19] : memref<3x128x128xf32, #tpu.memory_space<vmem>>, vector<1x128x128xf32>
    %36 = vector.shape_cast %35 : vector<1x128x128xf32> to vector<128x128xf32>
    %c1_20 = arith.constant 1 : index
    %c0_21 = arith.constant 0 : index
    %c0_22 = arith.constant 0 : index
    %37 = vector.load %arg3[%c1_20, %c0_21, %c0_22] : memref<3x1x128xf32, #tpu.memory_space<vmem>>, vector<1x1x128xf32>
    %38 = vector.shape_cast %37 : vector<1x1x128xf32> to vector<1x128xf32>
    %c1_23 = arith.constant 1 : index
    %c0_24 = arith.constant 0 : index
    %c0_25 = arith.constant 0 : index
    %39 = vector.load %arg4[%c1_23, %c0_24, %c0_25] : memref<3x1x128xf32, #tpu.memory_space<vmem>>, vector<1x1x128xf32>
    %40 = vector.shape_cast %39 : vector<1x1x128xf32> to vector<1x128xf32>
    %cst_26 = arith.constant dense<0.000000e+00> : vector<8x128xf32>
    %41 = tpu.matmul %34, %36, %cst_26 {dimension_numbers = #tpu.dot_dimension_numbers<[1], [0], [0], [1], [0, 0, 1, 1], [], []>} : vector<8x128xf32>, vector<128x128xf32>, vector<8x128xf32> -> vector<8x128xf32>
    %cst_27 = arith.constant dense<0.000000e+00> : vector<128xf32>
    %42 = vector.multi_reduction <add>, %41, %cst_27 [0] : vector<8x128xf32> to vector<128xf32>
    %43 = vector.shape_cast %42 : vector<128xf32> to vector<1x128xf32>
    %44 = arith.mulf %41, %41 : vector<8x128xf32>
    %cst_28 = arith.constant dense<0.000000e+00> : vector<128xf32>
    %45 = vector.multi_reduction <add>, %44, %cst_28 [0] : vector<8x128xf32> to vector<128xf32>
    %46 = vector.shape_cast %45 : vector<128xf32> to vector<1x128xf32>
    %cst_29 = arith.constant 1.250000e-01 : f32
    %47 = vector.broadcast %cst_29 : f32 to vector<1x128xf32>
    %48 = arith.mulf %43, %47 : vector<1x128xf32>
    %cst_30 = arith.constant 1.250000e-01 : f32
    %49 = vector.broadcast %cst_30 : f32 to vector<1x128xf32>
    %50 = arith.mulf %46, %49 : vector<1x128xf32>
    %51 = arith.mulf %48, %48 : vector<1x128xf32>
    %52 = arith.subf %50, %51 : vector<1x128xf32>
    %cst_31 = arith.constant 0.000000e+00 : f32
    %53 = vector.broadcast %cst_31 : f32 to vector<1x128xf32>
    %54 = arith.maximumf %52, %53 : vector<1x128xf32>
    %cst_32 = arith.constant 9.99999974E-6 : f32
    %55 = vector.broadcast %cst_32 : f32 to vector<1x128xf32>
    %56 = arith.addf %54, %55 : vector<1x128xf32>
    %57 = math.rsqrt %56 : vector<1x128xf32>
    %58 = arith.mulf %38, %57 : vector<1x128xf32>
    %59 = arith.mulf %48, %58 : vector<1x128xf32>
    %60 = arith.subf %40, %59 : vector<1x128xf32>
    %61 = vector.broadcast %58 : vector<1x128xf32> to vector<8x128xf32>
    %62 = arith.mulf %41, %61 : vector<8x128xf32>
    %63 = vector.broadcast %60 : vector<1x128xf32> to vector<8x128xf32>
    %64 = arith.addf %62, %63 : vector<8x128xf32>
    %cst_33 = arith.constant 0.000000e+00 : f32
    %65 = vector.broadcast %cst_33 : f32 to vector<8x128xf32>
    %66 = arith.maximumf %64, %65 : vector<8x128xf32>
    %67 = arith.addf %34, %66 : vector<8x128xf32>
    %c2 = arith.constant 2 : index
    %c0_34 = arith.constant 0 : index
    %c0_35 = arith.constant 0 : index
    %68 = vector.load %arg2[%c2, %c0_34, %c0_35] : memref<3x128x128xf32, #tpu.memory_space<vmem>>, vector<1x128x128xf32>
    %69 = vector.shape_cast %68 : vector<1x128x128xf32> to vector<128x128xf32>
    %c2_36 = arith.constant 2 : index
    %c0_37 = arith.constant 0 : index
    %c0_38 = arith.constant 0 : index
    %70 = vector.load %arg3[%c2_36, %c0_37, %c0_38] : memref<3x1x128xf32, #tpu.memory_space<vmem>>, vector<1x1x128xf32>
    %71 = vector.shape_cast %70 : vector<1x1x128xf32> to vector<1x128xf32>
    %c2_39 = arith.constant 2 : index
    %c0_40 = arith.constant 0 : index
    %c0_41 = arith.constant 0 : index
    %72 = vector.load %arg4[%c2_39, %c0_40, %c0_41] : memref<3x1x128xf32, #tpu.memory_space<vmem>>, vector<1x1x128xf32>
    %73 = vector.shape_cast %72 : vector<1x1x128xf32> to vector<1x128xf32>
    %cst_42 = arith.constant dense<0.000000e+00> : vector<8x128xf32>
    %74 = tpu.matmul %67, %69, %cst_42 {dimension_numbers = #tpu.dot_dimension_numbers<[1], [0], [0], [1], [0, 0, 1, 1], [], []>} : vector<8x128xf32>, vector<128x128xf32>, vector<8x128xf32> -> vector<8x128xf32>
    %cst_43 = arith.constant dense<0.000000e+00> : vector<128xf32>
    %75 = vector.multi_reduction <add>, %74, %cst_43 [0] : vector<8x128xf32> to vector<128xf32>
    %76 = vector.shape_cast %75 : vector<128xf32> to vector<1x128xf32>
    %77 = arith.mulf %74, %74 : vector<8x128xf32>
    %cst_44 = arith.constant dense<0.000000e+00> : vector<128xf32>
    %78 = vector.multi_reduction <add>, %77, %cst_44 [0] : vector<8x128xf32> to vector<128xf32>
    %79 = vector.shape_cast %78 : vector<128xf32> to vector<1x128xf32>
    %cst_45 = arith.constant 1.250000e-01 : f32
    %80 = vector.broadcast %cst_45 : f32 to vector<1x128xf32>
    %81 = arith.mulf %76, %80 : vector<1x128xf32>
    %cst_46 = arith.constant 1.250000e-01 : f32
    %82 = vector.broadcast %cst_46 : f32 to vector<1x128xf32>
    %83 = arith.mulf %79, %82 : vector<1x128xf32>
    %84 = arith.mulf %81, %81 : vector<1x128xf32>
    %85 = arith.subf %83, %84 : vector<1x128xf32>
    %cst_47 = arith.constant 0.000000e+00 : f32
    %86 = vector.broadcast %cst_47 : f32 to vector<1x128xf32>
    %87 = arith.maximumf %85, %86 : vector<1x128xf32>
    %cst_48 = arith.constant 9.99999974E-6 : f32
    %88 = vector.broadcast %cst_48 : f32 to vector<1x128xf32>
    %89 = arith.addf %87, %88 : vector<1x128xf32>
    %90 = math.rsqrt %89 : vector<1x128xf32>
    %91 = arith.mulf %71, %90 : vector<1x128xf32>
    %92 = arith.mulf %81, %91 : vector<1x128xf32>
    %93 = arith.subf %73, %92 : vector<1x128xf32>
    %94 = vector.broadcast %91 : vector<1x128xf32> to vector<8x128xf32>
    %95 = arith.mulf %74, %94 : vector<8x128xf32>
    %96 = vector.broadcast %93 : vector<1x128xf32> to vector<8x128xf32>
    %97 = arith.addf %95, %96 : vector<8x128xf32>
    %cst_49 = arith.constant 0.000000e+00 : f32
    %98 = vector.broadcast %cst_49 : f32 to vector<8x128xf32>
    %99 = arith.maximumf %97, %98 : vector<8x128xf32>
    %c0_50 = arith.constant 0 : index
    %c0_51 = arith.constant 0 : index
    %c0_52 = arith.constant 0 : index
    %100 = vector.load %arg5[%c0_50, %c0_51, %c0_52] : memref<1x8x128xf32, #tpu.memory_space<vmem>>, vector<1x8x128xf32>
    %101 = vector.shape_cast %100 : vector<1x8x128xf32> to vector<8x128xf32>
    %102 = vector.shape_cast %99 : vector<8x128xf32> to vector<1x8x128xf32>
    tpu.vector_store %arg5[%c0_50, %c0_51, %c0_52], %102 {strides = array<i32>} : memref<1x8x128xf32, #tpu.memory_space<vmem>>, vector<1x8x128xf32>,
    return
  }
  func.func @transform_0(%arg0: i32) -> (i32, i32, i32) {
    %c0_i32 = arith.constant 0 : i32
    %c0_i32_0 = arith.constant 0 : i32
    %c0_i32_1 = arith.constant 0 : i32
    return %arg0, %c0_i32, %c0_i32_0 : i32, i32, i32
  }
  func.func @transform_1(%arg0: i32) -> (i32, i32, i32) {
    %c0_i32 = arith.constant 0 : i32
    %c0_i32_0 = arith.constant 0 : i32
    %c0_i32_1 = arith.constant 0 : i32
    %c0_i32_2 = arith.constant 0 : i32
    return %c0_i32, %c0_i32_0, %c0_i32_1 : i32, i32, i32
  }
  func.func @transform_2(%arg0: i32) -> (i32, i32, i32) {
    %c0_i32 = arith.constant 0 : i32
    %c0_i32_0 = arith.constant 0 : i32
    %c0_i32_1 = arith.constant 0 : i32
    %c0_i32_2 = arith.constant 0 : i32
    return %c0_i32, %c0_i32_0, %c0_i32_1 : i32, i32, i32
  }
  func.func @transform_3(%arg0: i32) -> (i32, i32, i32) {
    %c0_i32 = arith.constant 0 : i32
    %c0_i32_0 = arith.constant 0 : i32
    %c0_i32_1 = arith.constant 0 : i32
    %c0_i32_2 = arith.constant 0 : i32
    return %c0_i32, %c0_i32_0, %c0_i32_1 : i32, i32, i32
  }
  func.func @transform_4(%arg0: i32) -> (i32, i32, i32) {
    %c0_i32 = arith.constant 0 : i32
    %c0_i32_0 = arith.constant 0 : i32
    %c0_i32_1 = arith.constant 0 : i32
    return %arg0, %c0_i32, %c0_i32_0 : i32, i32, i32
  }
}

</mosaic_0001>

<bundles_post_ra>
// kernel: tpu_custom_call.1
= control target key start
LH: loop header
LB: loop body
LE: loop exit
PB: predicated region body
PF: predicated region fallthrough
CT: control target
= control target key end

     0   :  { %9 = vsyncpa [#allocation3], 0  ;;  %s1131_s0 = inlined_call_operand.hbm [shape: f32[2,8,128], index: 0, kind: input, shape index: {}]   ;;  %s1132_s1 = inlined_call_operand.hbm [shape: f32[3,128,128], index: 1, kind: input, shape index: {}]   ;;  %s1133_s2 = inlined_call_operand.hbm [shape: f32[3,1,128], index: 2, kind: input, shape index: {}]   ;;  %s1134_s3 = inlined_call_operand.hbm [shape: f32[3,1,128], index: 3, kind: input, shape index: {}]   ;;  %s1135_s4 = inlined_call_operand.hbm [shape: f32[2,8,128], index: 4, kind: output, shape index: {}]  }
   0x1   :  { %11 = vsyncpa [#allocation3 + $0x1], 0 }
   0x2   :  { %12 = vsyncpa [#allocation6], 0 }
   0x3   :  { %13 = vsyncpa [#allocation9], 0 }
   0x4   :  { %14 = vsyncpa [#allocation4], 0 }
   0x5   :  { %16 = vsyncpa [#allocation4 + $0x1], 0  ;;  %s960_s15 = smov 0   ;;  %s962_s16 = smov 0  }
   0x6   :  { %s964_s17 = smov 0   ;;  %s966_s18 = smov 0  }
   0x7 LB: > { %s153_s21 = sshll.u32 %s1132_s1, 4  ;;  %s984_s22 = sadd.s32 4294967295, %s926_s18   ;;  %s926_s18 = sphi %s966_s18, %s1146_s18   ;;  %s922_s17 = sphi %s964_s17, %s1145_s17   ;;  %s918_s16 = sphi %s962_s16, %s1144_s16   ;;  %s914_s15 = sphi %s960_s15, %s1143_s15   ;;  %s154_s21 = int_to_ptr.hbm [resolvable:$true] %s153_s21 }
   0x8   : > { %p628_p0 = scmp.ge.s32.totalorder %s926_s18, 1  ;;  %p43_p1 = scmp.eq.s32.totalorder %s984_s22, 0 }
   0x9   : > { %p142_p2 = scmp.lt.s32.totalorder %s926_s18, 3  ;;  %s928_s24 = smov [#allocation5]  }
   0xa   : > { %s155_s25 = sshll.u32 %s928_s24, 4  ;;  %s167_s28 = sshll.u32 %s1133_s2, 4  ;;  %s156_s25 = int_to_ptr.vmem [resolvable:$true] %s155_s25  ;;  %s168_s28 = int_to_ptr.hbm [resolvable:$true] %s167_s28 }
   0xb   : > { %p989_p3 = pnand %p628_p0, %p142_p2  ;;  %s929_s30 = smov [#allocation7]  }
   0xc   : > { %s169_s5 = sshll.u32 %s929_s30, 4  ;;  %s930_s6 = smov 128   ;;  %s170_s5 = int_to_ptr.vmem [resolvable:$true] %s169_s5 }
   0xd   : > { %p661_p4 = pneg %p989_p3  ;;  %s931_s7 = smov 8  }
   0xe   : > { %s932_s8 = smov 16   ;;  %s933_s9 = smov 1  }
   0xf   : > { %p1001_p6 = pnand %p661_p4, %p43_p1  ;;  %s181_s12 = sshll.u32 %s1134_s3, 4  ;;  %s182_s12 = int_to_ptr.hbm [resolvable:$true] %s181_s12 }
  0x10   : > { %s934_s13 = smov [#allocation8]   ;;  %s627_s19 = sadd.s32 4294967294, %s926_s18  }
  0x11   : > { %664 = dma.hbm_to_vmem [thread:$0]  (!%p1001_p6), %s154_s21, 6144, %s156_s25, [#allocation6], %s930_s6, %s930_s6, %s931_s7  }
  0x12   : > { %667 = dma.hbm_to_vmem [thread:$0]  (!%p1001_p6), %s168_s28, 48, %s170_s5, [#allocation6], %s932_s8, %s932_s8, %s933_s9  }
  0x13   : > { %s183_s14 = sshll.u32 %s934_s13, 4  ;;  %s1016_s20 = sadd.s32 1, %s926_s18   ;;  %s184_s14 = int_to_ptr.vmem [resolvable:$true] %s183_s14 }
  0x14   : > { %670 = dma.hbm_to_vmem [thread:$0]  (!%p1001_p6), %s182_s12, 48, %s184_s14, [#allocation9], %s932_s8, %s932_s8, %s933_s9  }
  0x15   : > { %s29_s21 = sadd.s32 1, %s922_s17  ;;  %s26_s24 = ssub.s32 %s926_s18, %s1016_s20 }
  0x16   : > { %p36_p7 = scmp.ne.s32.totalorder %s922_s17, %s918_s16  ;;  %p27_p8 = scmp.eq.s32.totalorder %s26_s24, 0 }
  0x17   : > { %p37_p9 = scmp.eq.s32.totalorder %s926_s18, 0  ;;  %p42_p10 = scmp.ne.s32.totalorder %s918_s16, %s914_s15 }
  0x18   : > { %p129_p11 = scmp.eq.s32.totalorder %s984_s22, 1  ;;  %p135_p0 = scmp.eq.s32.totalorder %s627_s19, 1 }
  0x19   : > { %s1028_s25 = scalar_select %p27_p8, %s922_s17, %s29_s21  }
  0x1a   : > { %p1032_p12 = por %p43_p1, %p42_p10  ;;  %p1036_p13 = por %p129_p11, %p36_p7 }
  0x1b   : > { %p38_p2 = por %p37_p9, %p36_p7  ;;  %s197_s28 = sand.u32 1, %s922_s17  }
  0x1c   : > { %p1041_p4 = por %p135_p0, %p42_p10  ;;  %p682_p6 = scmp.lt.s32.totalorder %s926_s18, 2 }
  0x1d   : > { %s633_s30 = sshll.u32 %s197_s28, 3  ;;  %s634_s5 = sshll.u32 %s926_s18, 3 }
  0x1e   : > { %s205_s8 = scalar_lea.hbm %s1131_s0, %s634_s5  ;;  %s201_s10 = scalar_lea.vmem [#allocation2], %s633_s30 }
  0x1f   : > { %s207_s9 = sshll.u32 %s205_s8, 4  ;;  %s209_s11 = sshll.u32 %s201_s10, 4  ;;  %s208_s9 = int_to_ptr.hbm [resolvable:$true] %s207_s9  ;;  %s210_s11 = int_to_ptr.vmem [resolvable:$true] %s209_s11 }
  0x20   : > { %p1050_p8 = pnand %p682_p6, %p38_p2  ;;  %s198_s13 = scalar_lea.sflag [#allocation3], %s197_s28 }
  0x21   : > { %s822_s14 = sshra.s32 %s208_s9, 4  ;;  %s829_s30 = scalar_lea.hbm %s1131_s0, 16  ;;  %s823_s14 = int_to_ptr.hbm [resolvable:$true] %s822_s14 }
  0x22   : > { %s824_s19 = scalar_lea.hbm %s823_s14, 8  ;;  %p826_p9 = pneg %p1050_p8 }
  0x23   : > { %p825_p7 = scmp.ne.s32.totalorder %s823_s14, %s824_s19  ;;  %p830_p0 = scmp.lt.s32.totalorder %s823_s14, %s1131_s0 }
  0x24   : > { %p831_p2 = scmp.lt.s32.totalorder %s829_s30, %s824_s19 }
  0x25   : > { %p827_p10 = pnand %p826_p9, %p825_p7 }
  0x26   : > { %p832_p6 = por %p831_p2, %p830_p0 }
  0x27   : > { %p828_p11 = pneg %p827_p10 }
  0x29   : > { %p833_p5 = pnand %p832_p6, %p828_p11 }
  0x2b   : > { %836 = shalt.err (!%p833_p5)
}
  0x2c   : > { %674 = dma.hbm_to_vmem [thread:$0]  (!%p1050_p8), %s208_s9, 128, %s210_s11, %s198_s13  }
  0x2d   : > { %218 = sbr.rel (%p989_p3) target bundleno = 634 (0x27a), region = 36  ;;  %s1067_s28 = sand.u32 (!%p989_p3), 1, %s918_s16  }
  0x2e   : > { %s636_s7 = sshll.u32 (!%p989_p3), %s1067_s28, 3  ;;  %s221_s8 = scalar_lea.sflag (!%p989_p3), [#allocation3], %s1067_s28 }
  0x2f   : > { %s1073_s10 = scalar_lea.vmem (!%p989_p3), [#allocation2], %s636_s7 }
  0x32   : > { %897 = dma.done.wait (%p1032_p12), %s221_s8, 128  }
  0x33   : > { %899 = vsyncadd (%p1032_p12), %s221_s8, 4294967168 }
  0x34   : > { %901 = dma.done.wait (%p43_p1), [#allocation6], 6192  }
  0x35   : > { %903 = vsyncadd (%p43_p1), [#allocation6], 4294961104 }
  0x36   : > { %905 = dma.done.wait (%p43_p1), [#allocation9], 48  }
  0x37   : > { %907 = vsyncadd (%p43_p1), [#allocation9], 4294967248  ;;  %v281_v0 = vld [vmem:[#allocation5 + $0x78] sm:$0xff]  ;;  %v280_v1 = vld [vmem:[#allocation5 + $0x70] sm:$0xff]  ;;  %s642_s23 = sshll.u32 %s984_s22, 3  ;;  %s264_s12 = scalar_lea.vmem [#allocation10], %s636_s7 }
  0x38   : > { %284 = vmatpush.msra.mxu0 %v281_v0  ;;  %v279_v2 = vld [vmem:[#allocation5 + $0x68] sm:$0xff]  ;;  %v278_v3 = vld [vmem:[#allocation5 + $0x60] sm:$0xff]  ;;  %v277_v4 = vld [vmem:[#allocation5 + $0x58] sm:$0xff]  ;;  %s523_s11 = scalar_lea.hbm %s1135_s4, %s642_s23  ;;  %s525_s13 = sshll.u32 %s264_s12, 4  ;;  %s526_s13 = int_to_ptr.vmem [resolvable:$true] %s525_s13 }
  0x39   : > { %v276_v5 = vld [vmem:[#allocation5 + $0x50] sm:$0xff]  ;;  %v275_v6 = vld [vmem:[#allocation5 + $0x48] sm:$0xff]  ;;  %v274_v7 = vld [vmem:[#allocation5 + $0x40] sm:$0xff]  ;;  %s527_s14 = sshll.u32 %s523_s11, 4  ;;  %s513_s22 = scalar_lea.sflag [#allocation4], %s1067_s28  ;;  %s528_s14 = int_to_ptr.hbm [resolvable:$true] %s527_s14 }
  0x3a   : > { %285 = vmatpush.msra.mxu0 %v280_v1  ;;  %v273_v8 = vld [vmem:[#allocation5 + $0x38] sm:$0xff]  ;;  %v272_v9 = vld [vmem:[#allocation5 + $0x30] sm:$0xff]  ;;  %v271_v10 = vld [vmem:[#allocation5 + $0x28] sm:$0xff]  ;;  %s866_s19 = sshra.s32 %s528_s14, 4  ;;  %s872_s5 = scalar_lea.hbm %s1135_s4, 16  ;;  %s867_s19 = int_to_ptr.hbm [resolvable:$true] %s866_s19 }
  0x3b   : > { %v270_v11 = vld [vmem:[#allocation5 + $0x20] sm:$0xff]  ;;  %v269_v12 = vld [vmem:[#allocation5 + $0x18] sm:$0xff]  ;;  %v268_v13 = vld [vmem:[#allocation5 + $0x10] sm:$0xff]  ;;  %s868_s21 = scalar_lea.hbm %s867_s19, 8  ;;  %p873_p12 = scmp.lt.s32.totalorder %s867_s19, %s1135_s4 }
  0x3c   : > { %286 = vmatpush.msra.mxu0 %v279_v2  ;;  %v267_v14 = vld [vmem:[#allocation5 + $0x8] sm:$0xff]  ;;  %v266_v15 = vld [vmem:[#allocation5] sm:$0xff]  ;;  %v1088_v16 = vld [vmem:[%s1073_s10] sm:$0xff]  ;;  %p869_p1 = scmp.ne.s32.totalorder %s867_s19, %s868_s21  ;;  %p874_p8 = scmp.lt.s32.totalorder %s872_s5, %s868_s21 }
  0x3d   : > { %v362_v17 = vld [vmem:[#allocation5 + $0xf8] sm:$0xff]  ;;  %v361_v18 = vld [vmem:[#allocation5 + $0xf0] sm:$0xff]  ;;  %v360_v19 = vld [vmem:[#allocation5 + $0xe8] sm:$0xff] }
  0x3e   : > { %287 = vmatpush.msra.mxu0 %v278_v3  ;;  %367 = vmatpush.msra.mxu1 %v362_v17  ;;  %v359_v20 = vld [vmem:[#allocation5 + $0xe0] sm:$0xff]  ;;  %v358_v21 = vld [vmem:[#allocation5 + $0xd8] sm:$0xff]  ;;  %v357_v25 = vld [vmem:[#allocation5 + $0xd0] sm:$0xff]  ;;  %p870_p3 = pnand %p869_p1, %p1036_p13  ;;  %p875_p7 = por %p874_p8, %p873_p12 }
  0x3f   : > { %v356_v28 = vld [vmem:[#allocation5 + $0xc8] sm:$0xff]  ;;  %v355_v31 = vld [vmem:[#allocation5 + $0xc0] sm:$0xff]  ;;  %v354_v34 = vld [vmem:[#allocation5 + $0xb8] sm:$0xff] }
  0x40   : > { %288 = vmatpush.msra.mxu0 %v277_v4  ;;  %368 = vmatpush.msra.mxu1 %v361_v18  ;;  %v353_v37 = vld [vmem:[#allocation5 + $0xb0] sm:$0xff]  ;;  %v352_v40 = vld [vmem:[#allocation5 + $0xa8] sm:$0xff]  ;;  %v351_v43 = vld [vmem:[#allocation5 + $0xa0] sm:$0xff]  ;;  %p871_p5 = pneg %p870_p3 }
  0x41   : > { %v350_v44 = vld [vmem:[#allocation5 + $0x98] sm:$0xff]  ;;  %v349_v47 = vld [vmem:[#allocation5 + $0x90] sm:$0xff]  ;;  %v348_v49 = vld [vmem:[#allocation5 + $0x88] sm:$0xff] }
  0x42   : > { %289 = vmatpush.msra.mxu0 %v276_v5  ;;  %369 = vmatpush.msra.mxu1 %v360_v19  ;;  %v347_v51 = vld [vmem:[#allocation5 + $0x80] sm:$0xff]  ;;  %v439_v18 = vld [vmem:[#allocation5 + $0x148] sm:$0xff]  ;;  %p876_p9 = pnand %p875_p7, %p871_p5 }
  0x43   : > { %v282_v58 = vld [vmem:[#allocation7] sm:$0x1]  ;;  %v283_v62 = vld [vmem:[#allocation8] sm:$0x1] }
  0x44   : > { %290 = vmatpush.msra.mxu0 %v275_v6  ;;  %370 = vmatpush.msra.mxu1 %v359_v20 }
  0x46   : > { %291 = vmatpush.msra.mxu0 %v274_v7  ;;  %371 = vmatpush.msra.mxu1 %v358_v21  ;;  %v445_v7 = vld [vmem:[#allocation5 + $0x178] sm:$0xff]  ;;  %v438_v21 = vld [vmem:[#allocation5 + $0x140] sm:$0xff] }
  0x47   : > { %450 = vmatpush.msra.mxu2 %v445_v7 }
  0x48   : > { %292 = vmatpush.msra.mxu0 %v273_v8  ;;  %372 = vmatpush.msra.mxu1 %v357_v25  ;;  %v444_v8 = vld [vmem:[#allocation5 + $0x170] sm:$0xff] }
  0x49   : > { %451 = vmatpush.msra.mxu2 %v444_v8 }
  0x4a   : > { %293 = vmatpush.msra.mxu0 %v272_v9  ;;  %373 = vmatpush.msra.mxu1 %v356_v28  ;;  %v443_v9 = vld [vmem:[#allocation5 + $0x168] sm:$0xff] }
  0x4b   : > { %452 = vmatpush.msra.mxu2 %v443_v9 }
  0x4c   : > { %294 = vmatpush.msra.mxu0 %v271_v10  ;;  %374 = vmatpush.msra.mxu1 %v355_v31  ;;  %v442_v10 = vld [vmem:[#allocation5 + $0x160] sm:$0xff] }
  0x4d   : > { %453 = vmatpush.msra.mxu2 %v442_v10 }
  0x4e   : > { %295 = vmatpush.msra.mxu0 %v270_v11  ;;  %375 = vmatpush.msra.mxu1 %v354_v34  ;;  %v441_v11 = vld [vmem:[#allocation5 + $0x158] sm:$0xff] }
  0x4f   : > { %454 = vmatpush.msra.mxu2 %v441_v11  ;;  %v433_v34 = vld [vmem:[#allocation5 + $0x118] sm:$0xff] }
  0x50   : > { %296 = vmatpush.msra.mxu0 %v269_v12  ;;  %376 = vmatpush.msra.mxu1 %v353_v37  ;;  %v432_v37 = vld [vmem:[#allocation5 + $0x110] sm:$0xff] }
  0x52   : > { %297 = vmatpush.msra.mxu0 %v268_v13  ;;  %377 = vmatpush.msra.mxu1 %v352_v40 }
  0x54   : > { %298 = vmatpush.msra.mxu0 %v267_v14  ;;  %378 = vmatpush.msra.mxu1 %v351_v43 }
  0x56   : > { %299 = vmatpush.msra.mxu0 %v266_v15  ;;  %379 = vmatpush.msra.mxu1 %v350_v44  ;;  %v440_v15 = vld [vmem:[#allocation5 + $0x150] sm:$0xff] }
  0x57   : > { %300 = vmatmul.f32.vlgmr.msra.gmra.mxu0 %v1088_v16  ;;  %455 = vmatpush.msra.mxu2 %v440_v15 }
  0x58   : > { %380 = vmatpush.msra.mxu1 %v349_v47 }
  0x59   : > { %456 = vmatpush.msra.mxu2 %v439_v18 }
  0x5a   : > { %381 = vmatpush.msra.mxu1 %v348_v49 }
  0x5b   : > { %457 = vmatpush.msra.mxu2 %v438_v21 }
  0x5c   : > { %382 = vmatpush.msra.mxu1 %v347_v51 }
  0xd4   : > { %v301_v22 = vpop.f32.mrf.mxu0 }
  0xd5   : > { %v304_v23 = vrot.slane %v301_v22, 4  ;;  %v310_v24 = vmul.f32 %v301_v22, %v301_v22 }
  0xd7   : > { %v305_v26 = vadd.f32 %v304_v23, %v301_v22  ;;  %v311_v27 = vrot.slane %v310_v24, 4 }
  0xd9   : > { %v306_v29 = vrot.slane %v305_v26, 2  ;;  %v312_v30 = vadd.f32 %v311_v27, %v310_v24  ;;  %v437_v24 = vld [vmem:[#allocation5 + $0x138] sm:$0xff]  ;;  %v436_v27 = vld [vmem:[#allocation5 + $0x130] sm:$0xff] }
  0xda   : > { %458 = vmatpush.msra.mxu2 %v437_v24 }
  0xdb   : > { %v307_v32 = vadd.f32 %v306_v29, %v305_v26  ;;  %v313_v33 = vrot.slane %v312_v30, 2 }
  0xdc   : > { %459 = vmatpush.msra.mxu2 %v436_v27 }
  0xdd   : > { %v308_v35 = vrot.slane %v307_v32, 1  ;;  %v314_v36 = vadd.f32 %v313_v33, %v312_v30  ;;  %v435_v30 = vld [vmem:[#allocation5 + $0x128] sm:$0xff]  ;;  %v434_v33 = vld [vmem:[#allocation5 + $0x120] sm:$0xff] }
  0xde   : > { %460 = vmatpush.msra.mxu2 %v435_v30 }
  0xdf   : > { %v309_v38 = vadd.f32 %v308_v35, %v307_v32  ;;  %v315_v39 = vrot.slane %v314_v36, 1 }
  0xe0   : > { %461 = vmatpush.msra.mxu2 %v434_v33 }
  0xe1   : > { %v316_v41 = vadd.f32 %v315_v39, %v314_v36  ;;  %v317_v42 = vmul.f32 0.125, %v309_v38  ;;  %v431_v39 = vld [vmem:[#allocation5 + $0x108] sm:$0xff] }
  0xe2   : > { %462 = vmatpush.msra.mxu2 %v433_v34 }
  0xe3   : > { %v318_v45 = vmul.f32 0.125, %v316_v41  ;;  %v319_v46 = vmul.f32 %v317_v42, %v317_v42  ;;  %v430_v41 = vld [vmem:[#allocation5 + $0x100] sm:$0xff] }
  0xe4   : > { %463 = vmatpush.msra.mxu2 %v432_v37 }
  0xe5   : > { %v320_v48 = vsub.f32 %v318_v45, %v319_v46 }
  0xe6   : > { %464 = vmatpush.msra.mxu2 %v431_v39 }
  0xe7   : > { %v321_v50 = vmax.f32 %v320_v48, 0.0  ;;  %v364_v48 = vld [vmem:[#allocation7 + $0x1] sm:$0x1] }
  0xe8   : > { %465 = vmatpush.msra.mxu2 %v430_v41 }
  0xe9   : > { %v322_v52 = vadd.f32 1e-05, %v321_v50 }
  0xeb   : > { %726 = vrsqrt.f32 %v322_v52  ;;  %vm329_vm1 = vweird.f32 %v322_v52 }
  0xf1   : > { %v727_v53 = vpop.eup %726 }
  0xf2   : > { %v324_v54 = vmul.f32 %v727_v53, %v322_v52  ;;  %vm330_vm0 = vweird.f32 %v727_v53  ;;  %v366_v52 = vld [vmem:[#allocation8 + $0x1] sm:$0x1] }
  0xf3   : > { %vm331_vm2 = vmor %vm329_vm1, %vm330_vm0 }
  0xf4   : > { %v325_v55 = vmul.f32 %v727_v53, %v324_v54 }
  0xf6   : > { %v326_v56 = vmul.f32 0.5, %v325_v55 }
  0xf8   : > { %v327_v57 = vsub.f32 1.5, %v326_v56 }
  0xfa   : > { %v328_v59 = vmul.f32 %v727_v53, %v327_v57 }
  0xfc   : > { %v332_v60 = vsel %vm331_vm2, %v727_v53, %v328_v59 }
  0xfd   : > { %v333_v61 = vmul.f32 %v332_v60, %v282_v58 }
  0xff   : > { %v337_v63 = vperm.slane %v333_v61, 0  ;;  %v334_v0 = vmul.f32 %v333_v61, %v317_v42 }
 0x101   : > { %v335_v1 = vsub.f32 %v283_v62, %v334_v0  ;;  %v339_v2 = vmul.f32 %v337_v63, %v301_v22 }
 0x103   : > { %v341_v3 = vperm.slane %v335_v1, 0 }
 0x105   : > { %v343_v4 = vadd.f32 %v341_v3, %v339_v2 }
 0x107   : > { %v344_v5 = vmax.f32 %v343_v4, 0.0 }
 0x109   : > { %v1092_v6 = vadd.f32 %v344_v5, %v1088_v16 }
 0x10b   : > { %383 = vmatmul.f32.vlgmr.msra.gmra.mxu1 %v1092_v6 }
 0x188   : > { %v384_v12 = vpop.f32.mrf.mxu1 }
 0x189   : > { %v387_v13 = vrot.slane %v384_v12, 4  ;;  %v393_v14 = vmul.f32 %v384_v12, %v384_v12 }
 0x18b   : > { %v388_v17 = vadd.f32 %v387_v13, %v384_v12  ;;  %v394_v16 = vrot.slane %v393_v14, 4 }
 0x18d   : > { %v389_v19 = vrot.slane %v388_v17, 2  ;;  %v395_v20 = vadd.f32 %v394_v16, %v393_v14 }
 0x18f   : > { %v390_v22 = vadd.f32 %v389_v19, %v388_v17  ;;  %v396_v23 = vrot.slane %v395_v20, 2 }
 0x191   : > { %v391_v25 = vrot.slane %v390_v22, 1  ;;  %v397_v26 = vadd.f32 %v396_v23, %v395_v20 }
 0x193   : > { %v392_v28 = vadd.f32 %v391_v25, %v390_v22  ;;  %v398_v29 = vrot.slane %v397_v26, 1  ;;  %v447_v22 = vld [vmem:[#allocation7 + $0x2] sm:$0x1] }
 0x195   : > { %v399_v31 = vadd.f32 %v398_v29, %v397_v26  ;;  %v400_v32 = vmul.f32 0.125, %v392_v28  ;;  %v449_v26 = vld [vmem:[#allocation8 + $0x2] sm:$0x1] }
 0x197   : > { %v401_v35 = vmul.f32 0.125, %v399_v31  ;;  %v402_v36 = vmul.f32 %v400_v32, %v400_v32 }
 0x199   : > { %v403_v38 = vsub.f32 %v401_v35, %v402_v36 }
 0x19b   : > { %v404_v40 = vmax.f32 %v403_v38, 0.0 }
 0x19d   : > { %v405_v42 = vadd.f32 1e-05, %v404_v40 }
 0x19f   : > { %728 = vrsqrt.f32 %v405_v42  ;;  %vm412_vm4 = vweird.f32 %v405_v42 }
 0x1a5   : > { %v729_v43 = vpop.eup %728 }
 0x1a6   : > { %v407_v44 = vmul.f32 %v729_v43, %v405_v42  ;;  %vm413_vm3 = vweird.f32 %v729_v43 }
 0x1a7   : > { %vm414_vm5 = vmor %vm412_vm4, %vm413_vm3 }
 0x1a8   : > { %v408_v45 = vmul.f32 %v729_v43, %v407_v44 }
 0x1aa   : > { %v409_v46 = vmul.f32 0.5, %v408_v45 }
 0x1ac   : > { %v410_v47 = vsub.f32 1.5, %v409_v46 }
 0x1ae   : > { %v411_v49 = vmul.f32 %v729_v43, %v410_v47 }
 0x1b0   : > { %v415_v50 = vsel %vm414_vm5, %v729_v43, %v411_v49 }
 0x1b1   : > { %v416_v51 = vmul.f32 %v415_v50, %v364_v48 }
 0x1b3   : > { %v420_v53 = vperm.slane %v416_v51, 0  ;;  %v417_v54 = vmul.f32 %v416_v51, %v400_v32 }
 0x1b5   : > { %v418_v55 = vsub.f32 %v366_v52, %v417_v54  ;;  %v422_v56 = vmul.f32 %v420_v53, %v384_v12 }
 0x1b7   : > { %v424_v57 = vperm.slane %v418_v55, 0 }
 0x1b9   : > { %v426_v58 = vadd.f32 %v424_v57, %v422_v56 }
 0x1bb   : > { %v427_v59 = vmax.f32 %v426_v58, 0.0 }
 0x1bd   : > { %v428_v60 = vadd.f32 %v427_v59, %v1092_v6 }
 0x1bf   : > { %466 = vmatmul.f32.vlgmr.msra.gmra.mxu2 %v428_v60 }
 0x242   : > { %v467_v61 = vpop.f32.mrf.mxu2 }
 0x243   : > { %v470_v62 = vrot.slane %v467_v61, 4  ;;  %v476_v63 = vmul.f32 %v467_v61, %v467_v61 }
 0x245   : > { %v471_v0 = vadd.f32 %v470_v62, %v467_v61  ;;  %v477_v1 = vrot.slane %v476_v63, 4 }
 0x247   : > { %v472_v2 = vrot.slane %v471_v0, 2  ;;  %v478_v3 = vadd.f32 %v477_v1, %v476_v63 }
 0x249   : > { %v473_v4 = vadd.f32 %v472_v2, %v471_v0  ;;  %v479_v5 = vrot.slane %v478_v3, 2 }
 0x24b   : > { %v474_v7 = vrot.slane %v473_v4, 1  ;;  %v480_v8 = vadd.f32 %v479_v5, %v478_v3 }
 0x24d   : > { %v475_v9 = vadd.f32 %v474_v7, %v473_v4  ;;  %v481_v10 = vrot.slane %v480_v8, 1 }
 0x24f   : > { %v482_v11 = vadd.f32 %v481_v10, %v480_v8  ;;  %v483_v12 = vmul.f32 0.125, %v475_v9 }
 0x251   : > { %v484_v13 = vmul.f32 0.125, %v482_v11  ;;  %v485_v14 = vmul.f32 %v483_v12, %v483_v12 }
 0x253   : > { %v486_v15 = vsub.f32 %v484_v13, %v485_v14 }
 0x255   : > { %v487_v6 = vmax.f32 %v486_v15, 0.0 }
 0x257   : > { %v488_v17 = vadd.f32 1e-05, %v487_v6 }
 0x259   : > { %730 = vrsqrt.f32 %v488_v17  ;;  %vm495_vm7 = vweird.f32 %v488_v17 }
 0x25f   : > { %v731_v16 = vpop.eup %730 }
 0x260   : > { %v490_v18 = vmul.f32 %v731_v16, %v488_v17  ;;  %vm496_vm6 = vweird.f32 %v731_v16 }
 0x261   : > { %vm497_vm8 = vmor %vm495_vm7, %vm496_vm6 }
 0x262   : > { %v491_v19 = vmul.f32 %v731_v16, %v490_v18 }
 0x264   : > { %v492_v20 = vmul.f32 0.5, %v491_v19 }
 0x266   : > { %v493_v21 = vsub.f32 1.5, %v492_v20 }
 0x268   : > { %v494_v23 = vmul.f32 %v731_v16, %v493_v21 }
 0x26a   : > { %v498_v24 = vsel %vm497_vm8, %v731_v16, %v494_v23 }
 0x26b   : > { %v499_v25 = vmul.f32 %v498_v24, %v447_v22 }
 0x26d   : > { %v500_v27 = vmul.f32 %v499_v25, %v483_v12  ;;  %v503_v28 = vperm.slane %v499_v25, 0 }
 0x26f   : > { %v501_v29 = vsub.f32 %v449_v26, %v500_v27  ;;  %v505_v30 = vmul.f32 %v503_v28, %v467_v61 }
 0x271   : > { %v507_v31 = vperm.slane %v501_v29, 0 }
 0x273   : > { %v509_v32 = vadd.f32 %v507_v31, %v505_v30 }
 0x275   : > { %v510_v33 = vmax.f32 %v509_v32, 0.0 }
 0x277   : > { %511 = vst [vmem:[%s264_s12] sm:$0xff] %v510_v33 }
 0x278   : > { %879 = shalt.err (!%p876_p9)
}
 0x279   : > { %659 = dma.vmem_to_hbm [thread:$0]  (%p1036_p13), %s526_s13, 128, %s528_s14, %s513_s22  }
 0x27a PF: > { %s539_s28 = sand.u32 1, %s914_s15   ;;  %p1142_p10 = scmp.ge.s32.totalorder %s926_s18, 2 }
 0x27b   : > { %s540_s8 = scalar_lea.sflag [#allocation4], %s539_s28 }
 0x27c   : > { %p676_p11 = pnand %p1142_p10, %p1041_p4 }
 0x27e   : > { %p677_p0 = pneg %p676_p11 }
 0x280   : > { %909 = dma.done.wait (%p677_p0), %s540_s8, 128  }
 0x281   : > { %911 = vsyncadd (%p677_p0), %s540_s8, 4294967168  ;;  %p19_p2 = scmp.ge.s32.totalorder %s1016_s20, 4   ;;  %s1143_s15 = smov %s918_s16 }
 0x282   : > { %s1144_s16 = smov %s922_s17  ;;  %s1145_s17 = smov %s1028_s25 }
 0x283   : > { %s1146_s18 = smov %s1016_s20  ;;  %21 = sbr.rel (!%p19_p2) target bundleno = 7 (0x7), region = 99 }
 0x288   :  { %546 = vsyncpa [#allocation3], 1 }
 0x289   :  { %548 = vsyncpa [#allocation3 + $0x1], 1 }
 0x28a   :  { %549 = vsyncpa [#allocation6], 1 }
 0x28b   :  { %550 = vsyncpa [#allocation9], 1 }
 0x28c   :  { %551 = vsyncpa [#allocation4], 1 }
 0x28d   :  { %553 = vsyncpa [#allocation4 + $0x1], 1 }

</bundles_post_ra>
